<compile_context>
chip_gen: v7x
topology: tpu7x:2x2x1
jax: 0.10.0
libtpu: 0.0.40
codegen_flags: <defaults>
</compile_context>

<pallas_src>
import jax
import jax.numpy as jnp
from jax.experimental import pallas as pl
from jax.experimental.pallas import tpu as pltpu


def _identity_kernel(x_ref, o_ref):
    # TODO(synk): TorchBaseModule.forward_once is abstract (returns
    # NotImplementedError); identity is the only faithful concrete realization.
    # NOTE: input_output_aliases={0: 0} below is only safe while this stays an
    # elementwise identity per tile; revisit if real (non-elementwise) compute
    # is added here (read-after-write hazard across tiles / v7x cores).
    o_ref[...] = x_ref[...]


_TILED_THRESHOLD_BYTES = 4 << 20    # above this, use the row-tiled pipeline
_VMEM_LIMIT_BYTES = 32 << 20        # 2 BlockSpecs x 2 buffers x <=8 MiB tiles


def _tile_bytes_for_chip() -> int:
    """Target tile size: 4 MiB on v5e (lower HBM BW, 16 MiB default scoped
    VMEM), 8 MiB on v6e/v7x (higher HBM BW; fits 64 MiB physical VMEM)."""
    try:
        kind = jax.devices()[0].device_kind.lower()
    except Exception:
        kind = ""
    if "v5 lite" in kind or "v5e" in kind or "v5litepod" in kind:
        return 4 << 20
    return 8 << 20


# ------------------------- small inputs: grid-less ------------------------- #

def _identity_single_block(x2d: jax.Array) -> jax.Array:
    nbytes = x2d.size * x2d.dtype.itemsize
    return pl.pallas_call(
        _identity_kernel,
        out_shape=jax.ShapeDtypeStruct(x2d.shape, x2d.dtype),
        in_specs=[pl.BlockSpec(memory_space=pltpu.MemorySpace.VMEM)],
        out_specs=pl.BlockSpec(memory_space=pltpu.MemorySpace.VMEM),
        input_output_aliases={0: 0},
        cost_estimate=pl.CostEstimate(
            flops=0, transcendentals=0, bytes_accessed=2 * nbytes),
    )(x2d)


# -------------------- large inputs: tiled + pipelined ---------------------- #

def _pick_tile_rows(rows: int, cols: int, itemsize: int, tile_bytes: int) -> int:
    """Fixed large tile (multiple of 8 rows); ragged last block handled by the
    cdiv grid, so no exact-divisor search is needed."""
    if rows <= 8:
        return rows  # full-extent block satisfies the (8,128) rule
    target = max(8, (tile_bytes // max(1, cols * itemsize)) // 8 * 8)
    # Keep at least 2 tiles so the 'parallel' axis can shard across v7x's 2 TCs.
    cap = max(8, ((rows + 1) // 2) // 8 * 8)
    return int(min(target, cap))


def _identity_tiled(x2d: jax.Array, tile_r: int) -> jax.Array:
    rows, cols = x2d.shape
    nbytes = rows * cols * x2d.dtype.itemsize
    return pl.pallas_call(
        _identity_kernel,
        out_shape=jax.ShapeDtypeStruct(x2d.shape, x2d.dtype),
        grid=(pl.cdiv(rows, tile_r),),      # ragged last block is masked
        in_specs=[pl.BlockSpec((tile_r, cols), lambda i: (i, 0))],
        out_specs=pl.BlockSpec((tile_r, cols), lambda i: (i, 0)),
        input_output_aliases={0: 0},
        cost_estimate=pl.CostEstimate(
            flops=0, transcendentals=0, bytes_accessed=2 * nbytes),
        compiler_params=pltpu.CompilerParams(
            dimension_semantics=("parallel",),   # independent row tiles
            vmem_limit_bytes=_VMEM_LIMIT_BYTES,  # default Buffered(2) pipeline
        ),
    )(x2d)


@jax.jit
def forward_once_pallas(x: jax.Array) -> jax.Array:
    """Pallas copy skeleton for forward_once (kept for when real compute lands)."""
    orig_shape = x.shape
    # Lane-dense 2-D slab: collapse the last two dims into the lane axis,
    # everything else into rows.
    if x.ndim >= 2:
        cols = orig_shape[-1] * orig_shape[-2]
    elif x.ndim == 1:
        cols = orig_shape[-1]
    else:
        cols = 1
    cols = max(1, cols)
    rows = max(1, x.size // cols)
    x2d = x.reshape(rows, cols)

    nbytes = x.size * x.dtype.itemsize
    if nbytes >= _TILED_THRESHOLD_BYTES:
        tile_r = _pick_tile_rows(rows, cols, x.dtype.itemsize, _tile_bytes_for_chip())
        out2d = _identity_tiled(x2d, tile_r)
    else:
        out2d = _identity_single_block(x2d)
    return out2d.reshape(orig_shape)


# --------------------------- module-level forward -------------------------- #

# Perf review: for the identity case, do not launch a kernel at all.  Flip this
# flag to route through the Pallas skeleton once forward_once has real compute.
USE_PALLAS_COPY = False


def forward_once(x: jax.Array) -> jax.Array:
    """TorchBaseModule.forward_once realized as a zero-cost identity."""
    if USE_PALLAS_COPY:
        return forward_once_pallas(x)
    return x


def forward(batch) -> jax.Array:
    """Reproduces TorchBaseModule.forward: forward_once(batch[0])."""
    return forward_once(batch[0])


if __name__ == "__main__":
    key = jax.random.PRNGKey(0)
    # Small NCHW input consistent with a typical vision forward pass.
    x = jax.random.normal(key, (2, 4, 16, 16), dtype=jnp.float32)
    batch = (x,)

    # Default module forward: zero-cost identity pass-through.
    out = jax.block_until_ready(forward(batch))
    assert out.shape == x.shape and out.dtype == x.dtype
    assert bool(jnp.all(out == x))

    # Exercise the Pallas skeleton once (grid-less small-input path).
    out_k = jax.block_until_ready(forward_once_pallas(x))
    assert out_k.shape == x.shape and out_k.dtype == x.dtype
    assert bool(jnp.all(out_k == x))

    # Exercise the tiled path on a small slab with a forced small tile,
    # including a ragged last block (200 rows, tile_r=64 -> cdiv grid of 4).
    x2 = jax.random.normal(key, (200, 256), dtype=jnp.float32)
    tiled_fn = jax.jit(lambda a: _identity_tiled(a, 64))
    out_t = jax.block_until_ready(tiled_fn(x2))
    assert out_t.shape == x2.shape and bool(jnp.all(out_t == x2))

    print("KERNEL_OK")
</pallas_src>

<mosaic_0001>
module attributes {stable_mosaic.version = 11 : i64} {
  func.func @_identity_kernel(%arg0: memref<8x256xf32, #tpu.memory_space<vmem>>, %arg1: memref<8x256xf32, #tpu.memory_space<vmem>>) attributes {dimension_semantics = [], scalar_prefetch = 0 : i64, scratch_operands = 0 : i64, tpu.core_type = #tpu.core_type<tc>} {
    %c0 = arith.constant 0 : index
    %c0_0 = arith.constant 0 : index
    %0 = vector.load %arg0[%c0, %c0_0] : memref<8x256xf32, #tpu.memory_space<vmem>>, vector<8x256xf32>
    %c0_1 = arith.constant 0 : index
    %c0_2 = arith.constant 0 : index
    %1 = vector.load %arg1[%c0_1, %c0_2] : memref<8x256xf32, #tpu.memory_space<vmem>>, vector<8x256xf32>
    tpu.vector_store %arg1[%c0_1, %c0_2], %0 {strides = array<i32>} : memref<8x256xf32, #tpu.memory_space<vmem>>, vector<8x256xf32>,
    return
  }
}

</mosaic_0001>

<bundles_post_ra>
// kernel: forward_once_pallas.1
= control target key start
LH: loop header
LB: loop body
LE: loop exit
PB: predicated region body
PF: predicated region fallthrough
CT: control target
= control target key end

     0   :  { %s38_s0 = inlined_call_operand.vmem [shape: f32[8,256], index: 0, kind: input, shape index: {}, may-alias: {0,1}]   ;;  %s39_s1 = inlined_call_operand.vmem [shape: f32[8,256], index: 1, kind: output, shape index: {}, may-alias: {0,1}]  }
   0x1   :  { %v8_v0 = vld [vmem:[%s38_s0] sm:$0xff]  ;;  %v9_v1 = vld [vmem:[%s38_s0 + $0x8] sm:$0xff] }
   0x2   :  { %10 = vst [vmem:[%s39_s1] sm:$0xff] %v8_v0  ;;  %11 = vst [vmem:[%s39_s1 + $0x8] sm:$0xff] %v9_v1 }

</bundles_post_ra>
